<compile_context>
chip_gen: v7x
topology: tpu7x:2x2x1
jax: 0.10.0
libtpu: 0.0.40
codegen_flags: <defaults>
</compile_context>

<pallas_src>
import functools

import jax
import jax.numpy as jnp
from jax.experimental import pallas as pl
from jax.experimental.pallas import tpu as pltpu


# ---- padded layout constants -------------------------------------------------
GP = 128          # each GRU gate gets its own full 128-lane block
BP = 8            # batch padded to one sublane tile
FP = 128          # regression output padded to one lane-dense block
W_I_ROW = 0       # weight-slab row offsets (16-row aligned for bf16 tiles)
W_H_ROW = 16
W_R_ROW = 144
W_ROWS = 272


def _gru_decoder_kernel(x2d_ref, w_ref, b_ref, h0_ref, out_ref, hn_ref,
                        *, L, B, Bp, F):
    """Whole GRU-decoder forward in one invocation.

    x2d_ref: (L*Bp, F)      bf16, batch-padded, sequence-major
    w_ref  : (272, 3*GP)    bf16 packed weights  [wi3 | wh3 | wreg]
    b_ref  : (8, 3*GP)      f32 packed biases    [bx | b_hn | b_reg]
    h0_ref : (Bp, GP)       f32 padded initial hidden state
    out_ref: (L, FP)        f32 regression of the last batch row per timestep
    hn_ref : (Bp, GP)       f32 final hidden state (padded)
    """
    # Hoisted loop-invariant parameter loads (static ref slices).
    wi3 = w_ref[W_I_ROW:W_I_ROW + F, :]            # (F, 3*GP)   bf16
    wh3 = w_ref[W_H_ROW:W_H_ROW + GP, :]           # (GP, 3*GP)  bf16
    wrg = w_ref[W_R_ROW:W_R_ROW + GP, 0:FP]        # (GP, FP)    bf16
    bx = b_ref[0:1, :]                             # (1, 3*GP)   b_i (+ b_h for r,z)
    bhn = b_ref[1:2, 0:GP]                         # (1, GP)     b_hn (scaled by r)
    brg = b_ref[2:3, 0:FP]                         # (1, FP)     regression bias

    # ---- Phase 1: ONE batched input projection for all timesteps (h-free) ----
    xall = jnp.dot(x2d_ref[...], wi3,
                   preferred_element_type=jnp.float32) + bx      # (L*Bp, 3*GP)

    # ---- Phase 2: serial recurrence, fully unrolled at trace time ------------
    h = h0_ref[...]                                              # (Bp, GP) f32
    lasts = []
    for t in range(L):
        xp = xall[t * Bp:(t + 1) * Bp, :]          # sublane-aligned (Bp, 3*GP)
        hp = jnp.dot(h.astype(jnp.bfloat16), wh3,
                     preferred_element_type=jnp.float32)         # (Bp, 3*GP)
        # one sigmoid over the fused r|z block: 2 EUP pushes/step instead of 3
        rz = jax.nn.sigmoid(xp[:, 0:2 * GP] + hp[:, 0:2 * GP])   # (Bp, 2*GP)
        r = rz[:, 0:GP]
        z = rz[:, GP:2 * GP]
        # PyTorch GRU: n = tanh(W_in x + b_in + r * (W_hn h + b_hn))
        n = jnp.tanh(xp[:, 2 * GP:] + r * (hp[:, 2 * GP:] + bhn))
        h = (1.0 - z) * n + z * h
        # last *batch* row of this timestep's GRU output
        # (matches sequence_first_output[:, -1:, :] in the PyTorch module)
        lasts.append(h[B - 1:B, :])

    # Final hidden state written exactly once.
    hn_ref[...] = h

    # ---- Phase 3: one batched regression matmul + one lane-dense store -------
    last_all = jnp.concatenate(lasts, axis=0)                    # (L, GP)
    out = jnp.dot(last_all.astype(jnp.bfloat16), wrg,
                  preferred_element_type=jnp.float32) + brg      # (L, FP)
    out_ref[...] = out


def make_params(key, n_features, hidden_dim):
    """PyTorch-layout GRU + Linear params, U(-1/sqrt(H), 1/sqrt(H)) init."""
    H, F = hidden_dim, n_features
    k = 1.0 / jnp.sqrt(jnp.float32(H))
    keys = jax.random.split(key, 6)
    u = lambda kk, shape: jax.random.uniform(kk, shape, jnp.float32, -k, k)
    w_ih = u(keys[0], (3 * H, F))     # weight_ih_l0, gate order [r | z | n]
    w_hh = u(keys[1], (3 * H, H))     # weight_hh_l0
    b_ih = u(keys[2], (3 * H,))       # bias_ih_l0
    b_hh = u(keys[3], (3 * H,))       # bias_hh_l0
    w_reg = u(keys[4], (F, H))        # Linear.weight
    b_reg = u(keys[5], (F,))          # Linear.bias
    return (w_ih, w_hh, b_ih, b_hh, w_reg, b_reg)


def pack_params(params, n_features, hidden_dim):
    """Fuse + pad the six parameter arrays into two pre-padded VMEM slabs.

    Weight slab (bf16, (272, 3*GP)):
      rows [0, F)           : W_ih^T, each gate in its own 128-lane block
      rows [16, 16+GP)      : W_hh^T, gate- and hidden-padded to (GP, 3*GP)
      rows [144, 144+GP)    : W_reg^T padded to (GP, FP)
    Bias slab (f32, (8, 3*GP)):
      row 0 : [b_ir+b_hr | b_iz+b_hz | b_in]  (r/z hidden biases pre-folded)
      row 1 : b_hn (kept separate: PyTorch scales it by r)
      row 2 : b_reg
    """
    w_ih, w_hh, b_ih, b_hh, w_reg, b_reg = params
    H, F = hidden_dim, n_features

    w_slab = jnp.zeros((W_ROWS, 3 * GP), jnp.float32)
    for g in range(3):
        w_slab = w_slab.at[W_I_ROW:W_I_ROW + F, g * GP:g * GP + H].set(
            w_ih[g * H:(g + 1) * H, :].T)
        w_slab = w_slab.at[W_H_ROW:W_H_ROW + H, g * GP:g * GP + H].set(
            w_hh[g * H:(g + 1) * H, :].T)
    w_slab = w_slab.at[W_R_ROW:W_R_ROW + H, 0:F].set(w_reg.T)
    w_slab = w_slab.astype(jnp.bfloat16)

    b_slab = jnp.zeros((8, 3 * GP), jnp.float32)
    for g in range(2):   # r, z: fold the hidden bias into the Phase-1 bias
        b_slab = b_slab.at[0, g * GP:g * GP + H].set(
            b_ih[g * H:(g + 1) * H] + b_hh[g * H:(g + 1) * H])
    b_slab = b_slab.at[0, 2 * GP:2 * GP + H].set(b_ih[2 * H:3 * H])
    b_slab = b_slab.at[1, 0:H].set(b_hh[2 * H:3 * H])
    b_slab = b_slab.at[2, 0:F].set(b_reg)
    return w_slab, b_slab


def decoder_forward(X, h0, packed):
    """X: (L, B, F) f32, h0: (B, H) f32 -> (out (L,1,F), hn (B,H))."""
    L, B, F = X.shape
    H = h0.shape[-1]
    w_slab, b_slab = packed

    # Pad batch to a sublane tile / hidden to 128 lanes so every in-kernel
    # slice is vreg-aligned; cast MXU operands to bf16 (halves the X DMA too).
    x2d = jnp.pad(X, ((0, 0), (0, BP - B), (0, 0))).reshape(
        L * BP, F).astype(jnp.bfloat16)
    h0_p = jnp.pad(h0, ((0, BP - B), (0, GP - H)))

    vmem = pl.BlockSpec(memory_space=pltpu.MemorySpace.VMEM)
    kernel = functools.partial(_gru_decoder_kernel, L=L, B=B, Bp=BP, F=F)
    out_p, hn_p = pl.pallas_call(
        kernel,
        out_shape=(jax.ShapeDtypeStruct((L, FP), jnp.float32),
                   jax.ShapeDtypeStruct((BP, GP), jnp.float32)),
        in_specs=[vmem, vmem, vmem, vmem],
        out_specs=(vmem, vmem),
    )(x2d, w_slab, b_slab, h0_p)

    # (seq_len, 1, n_features): regression on sequence_first_output[:, -1:, :]
    out = out_p[:, :F].reshape(L, 1, F)
    hn = hn_p[:B, :H]
    return out, hn


def decoder_reference(X, h0, params, *, mxu_dtype=jnp.bfloat16):
    """Pure-JAX reference (lax.scan GRU, PyTorch gate order r,z,n).

    Matmul operands are cast to `mxu_dtype` (f32 accumulation) to mirror the
    kernel's MXU numerics; pass mxu_dtype=jnp.float32 for the exact module.
    """
    w_ih, w_hh, b_ih, b_hh, w_reg, b_reg = params
    H = h0.shape[-1]
    cast = lambda a: a.astype(mxu_dtype)
    wi = cast(w_ih.T)     # (F, 3H)
    wh = cast(w_hh.T)     # (H, 3H)

    def step(h, x):
        xp = jnp.dot(cast(x), wi, preferred_element_type=jnp.float32) + b_ih
        hp = jnp.dot(cast(h), wh, preferred_element_type=jnp.float32) + b_hh
        r = jax.nn.sigmoid(xp[:, :H] + hp[:, :H])
        z = jax.nn.sigmoid(xp[:, H:2 * H] + hp[:, H:2 * H])
        n = jnp.tanh(xp[:, 2 * H:] + r * hp[:, 2 * H:])
        h_new = (1.0 - z) * n + z * h
        return h_new, h_new

    h_final, seq = jax.lax.scan(step, h0, X)        # seq: (L, B, H)
    last = seq[:, -1:, :]                           # (L, 1, H) last batch row
    out = jnp.dot(cast(last), cast(w_reg.T),
                  preferred_element_type=jnp.float32) + b_reg
    return out, h_final


if __name__ == "__main__":
    n_features = 8
    hidden_dim = 32
    seq_len = 6
    batch = 4

    root = jax.random.PRNGKey(0)
    kx, kh, kp = jax.random.split(root, 3)

    X = jax.random.normal(kx, (seq_len, batch, n_features), jnp.float32)
    h0 = jax.random.normal(kh, (batch, hidden_dim), jnp.float32)
    params = make_params(kp, n_features, hidden_dim)
    packed = pack_params(params, n_features, hidden_dim)

    out, hn = decoder_forward(X, h0, packed)
    out = jax.block_until_ready(out)
    hn = jax.block_until_ready(hn)

    assert out.shape == (seq_len, 1, n_features)
    assert hn.shape == (batch, hidden_dim)

    # Reference with matching bf16 MXU-operand numerics (tight tolerance).
    out_ref, hn_ref = decoder_reference(X, h0, params)
    assert jnp.allclose(out, out_ref, atol=2e-3, rtol=2e-3)
    assert jnp.allclose(hn, hn_ref, atol=2e-3, rtol=2e-3)

    # Full-f32 module semantics (loose tolerance: expected bf16-operand drift).
    out_f32, hn_f32 = decoder_reference(X, h0, params, mxu_dtype=jnp.float32)
    assert jnp.allclose(out, out_f32, atol=2.5e-1, rtol=1e-1)
    assert jnp.allclose(hn, hn_f32, atol=2.5e-1, rtol=1e-1)

    print("KERNEL_OK")
</pallas_src>

<mosaic_0001>
module attributes {stable_mosaic.version = 11 : i64} {
  func.func @_gru_decoder_kernel(%arg0: memref<48x8xbf16, #tpu.memory_space<vmem>>, %arg1: memref<272x384xbf16, #tpu.memory_space<vmem>>, %arg2: memref<8x384xf32, #tpu.memory_space<vmem>>, %arg3: memref<8x128xf32, #tpu.memory_space<vmem>>, %arg4: memref<6x128xf32, #tpu.memory_space<vmem>>, %arg5: memref<8x128xf32, #tpu.memory_space<vmem>>) attributes {dimension_semantics = [], scalar_prefetch = 0 : i64, scratch_operands = 0 : i64, tpu.core_type = #tpu.core_type<tc>} {
    %c0 = arith.constant 0 : index
    %c0_0 = arith.constant 0 : index
    %0 = vector.load %arg1[%c0, %c0_0] : memref<272x384xbf16, #tpu.memory_space<vmem>>, vector<8x384xbf16>
    %c16 = arith.constant 16 : index
    %c0_1 = arith.constant 0 : index
    %1 = vector.load %arg1[%c16, %c0_1] : memref<272x384xbf16, #tpu.memory_space<vmem>>, vector<128x384xbf16>
    %c144 = arith.constant 144 : index
    %c0_2 = arith.constant 0 : index
    %2 = vector.load %arg1[%c144, %c0_2] : memref<272x384xbf16, #tpu.memory_space<vmem>>, vector<128x128xbf16>
    %c0_3 = arith.constant 0 : index
    %c0_4 = arith.constant 0 : index
    %3 = vector.load %arg2[%c0_3, %c0_4] : memref<8x384xf32, #tpu.memory_space<vmem>>, vector<1x384xf32>
    %c1 = arith.constant 1 : index
    %c0_5 = arith.constant 0 : index
    %4 = vector.load %arg2[%c1, %c0_5] : memref<8x384xf32, #tpu.memory_space<vmem>>, vector<1x128xf32>
    %c2 = arith.constant 2 : index
    %c0_6 = arith.constant 0 : index
    %5 = vector.load %arg2[%c2, %c0_6] : memref<8x384xf32, #tpu.memory_space<vmem>>, vector<1x128xf32>
    %c0_7 = arith.constant 0 : index
    %c0_8 = arith.constant 0 : index
    %6 = vector.load %arg0[%c0_7, %c0_8] : memref<48x8xbf16, #tpu.memory_space<vmem>>, vector<48x8xbf16>
    %cst = arith.constant dense<0.000000e+00> : vector<48x384xf32>
    %7 = tpu.matmul %6, %0, %cst {dimension_numbers = #tpu.dot_dimension_numbers<[1], [0], [0], [1], [0, 0, 1, 1], [], []>} : vector<48x8xbf16>, vector<8x384xbf16>, vector<48x384xf32> -> vector<48x384xf32>
    %8 = vector.broadcast %3 : vector<1x384xf32> to vector<48x384xf32>
    %9 = arith.addf %7, %8 : vector<48x384xf32>
    %c0_9 = arith.constant 0 : index
    %c0_10 = arith.constant 0 : index
    %10 = vector.load %arg3[%c0_9, %c0_10] : memref<8x128xf32, #tpu.memory_space<vmem>>, vector<8x128xf32>
    %11 = vector.extract_strided_slice %9 {offsets = [0, 0], sizes = [8, 384], strides = [1, 1]} : vector<48x384xf32> to vector<8x384xf32>
    %12 = arith.truncf %10 : vector<8x128xf32> to vector<8x128xbf16>
    %cst_11 = arith.constant dense<0.000000e+00> : vector<8x384xf32>
    %13 = tpu.matmul %12, %1, %cst_11 {dimension_numbers = #tpu.dot_dimension_numbers<[1], [0], [0], [1], [0, 0, 1, 1], [], []>} : vector<8x128xbf16>, vector<128x384xbf16>, vector<8x384xf32> -> vector<8x384xf32>
    %14 = vector.extract_strided_slice %11 {offsets = [0, 0], sizes = [8, 256], strides = [1, 1]} : vector<8x384xf32> to vector<8x256xf32>
    %15 = vector.extract_strided_slice %13 {offsets = [0, 0], sizes = [8, 256], strides = [1, 1]} : vector<8x384xf32> to vector<8x256xf32>
    %16 = arith.addf %14, %15 : vector<8x256xf32>
    %17 = arith.negf %16 : vector<8x256xf32>
    %18 = math.exp %17 : vector<8x256xf32>
    %cst_12 = arith.constant 1.000000e+00 : f32
    %19 = vector.broadcast %cst_12 : f32 to vector<8x256xf32>
    %20 = arith.addf %19, %18 : vector<8x256xf32>
    %21 = arith.divf %19, %20 : vector<8x256xf32>
    %22 = vector.extract_strided_slice %21 {offsets = [0, 0], sizes = [8, 128], strides = [1, 1]} : vector<8x256xf32> to vector<8x128xf32>
    %23 = vector.extract_strided_slice %21 {offsets = [0, 128], sizes = [8, 128], strides = [1, 1]} : vector<8x256xf32> to vector<8x128xf32>
    %24 = vector.extract_strided_slice %11 {offsets = [0, 256], sizes = [8, 128], strides = [1, 1]} : vector<8x384xf32> to vector<8x128xf32>
    %25 = vector.extract_strided_slice %13 {offsets = [0, 256], sizes = [8, 128], strides = [1, 1]} : vector<8x384xf32> to vector<8x128xf32>
    %26 = vector.broadcast %4 : vector<1x128xf32> to vector<8x128xf32>
    %27 = arith.addf %25, %26 : vector<8x128xf32>
    %28 = arith.mulf %22, %27 : vector<8x128xf32>
    %29 = arith.addf %24, %28 : vector<8x128xf32>
    %30 = math.tanh %29 : vector<8x128xf32>
    %cst_13 = arith.constant 1.000000e+00 : f32
    %31 = vector.broadcast %cst_13 : f32 to vector<8x128xf32>
    %32 = arith.subf %31, %23 : vector<8x128xf32>
    %33 = arith.mulf %32, %30 : vector<8x128xf32>
    %34 = arith.mulf %23, %10 : vector<8x128xf32>
    %35 = arith.addf %33, %34 : vector<8x128xf32>
    %36 = vector.extract_strided_slice %35 {offsets = [3, 0], sizes = [1, 128], strides = [1, 1]} : vector<8x128xf32> to vector<1x128xf32>
    %37 = vector.extract_strided_slice %9 {offsets = [8, 0], sizes = [8, 384], strides = [1, 1]} : vector<48x384xf32> to vector<8x384xf32>
    %38 = arith.truncf %35 : vector<8x128xf32> to vector<8x128xbf16>
    %cst_14 = arith.constant dense<0.000000e+00> : vector<8x384xf32>
    %39 = tpu.matmul %38, %1, %cst_14 {dimension_numbers = #tpu.dot_dimension_numbers<[1], [0], [0], [1], [0, 0, 1, 1], [], []>} : vector<8x128xbf16>, vector<128x384xbf16>, vector<8x384xf32> -> vector<8x384xf32>
    %40 = vector.extract_strided_slice %37 {offsets = [0, 0], sizes = [8, 256], strides = [1, 1]} : vector<8x384xf32> to vector<8x256xf32>
    %41 = vector.extract_strided_slice %39 {offsets = [0, 0], sizes = [8, 256], strides = [1, 1]} : vector<8x384xf32> to vector<8x256xf32>
    %42 = arith.addf %40, %41 : vector<8x256xf32>
    %43 = arith.negf %42 : vector<8x256xf32>
    %44 = math.exp %43 : vector<8x256xf32>
    %cst_15 = arith.constant 1.000000e+00 : f32
    %45 = vector.broadcast %cst_15 : f32 to vector<8x256xf32>
    %46 = arith.addf %45, %44 : vector<8x256xf32>
    %47 = arith.divf %45, %46 : vector<8x256xf32>
    %48 = vector.extract_strided_slice %47 {offsets = [0, 0], sizes = [8, 128], strides = [1, 1]} : vector<8x256xf32> to vector<8x128xf32>
    %49 = vector.extract_strided_slice %47 {offsets = [0, 128], sizes = [8, 128], strides = [1, 1]} : vector<8x256xf32> to vector<8x128xf32>
    %50 = vector.extract_strided_slice %37 {offsets = [0, 256], sizes = [8, 128], strides = [1, 1]} : vector<8x384xf32> to vector<8x128xf32>
    %51 = vector.extract_strided_slice %39 {offsets = [0, 256], sizes = [8, 128], strides = [1, 1]} : vector<8x384xf32> to vector<8x128xf32>
    %52 = vector.broadcast %4 : vector<1x128xf32> to vector<8x128xf32>
    %53 = arith.addf %51, %52 : vector<8x128xf32>
    %54 = arith.mulf %48, %53 : vector<8x128xf32>
    %55 = arith.addf %50, %54 : vector<8x128xf32>
    %56 = math.tanh %55 : vector<8x128xf32>
    %cst_16 = arith.constant 1.000000e+00 : f32
    %57 = vector.broadcast %cst_16 : f32 to vector<8x128xf32>
    %58 = arith.subf %57, %49 : vector<8x128xf32>
    %59 = arith.mulf %58, %56 : vector<8x128xf32>
    %60 = arith.mulf %49, %35 : vector<8x128xf32>
    %61 = arith.addf %59, %60 : vector<8x128xf32>
    %62 = vector.extract_strided_slice %61 {offsets = [3, 0], sizes = [1, 128], strides = [1, 1]} : vector<8x128xf32> to vector<1x128xf32>
    %63 = vector.extract_strided_slice %9 {offsets = [16, 0], sizes = [8, 384], strides = [1, 1]} : vector<48x384xf32> to vector<8x384xf32>
    %64 = arith.truncf %61 : vector<8x128xf32> to vector<8x128xbf16>
    %cst_17 = arith.constant dense<0.000000e+00> : vector<8x384xf32>
    %65 = tpu.matmul %64, %1, %cst_17 {dimension_numbers = #tpu.dot_dimension_numbers<[1], [0], [0], [1], [0, 0, 1, 1], [], []>} : vector<8x128xbf16>, vector<128x384xbf16>, vector<8x384xf32> -> vector<8x384xf32>
    %66 = vector.extract_strided_slice %63 {offsets = [0, 0], sizes = [8, 256], strides = [1, 1]} : vector<8x384xf32> to vector<8x256xf32>
    %67 = vector.extract_strided_slice %65 {offsets = [0, 0], sizes = [8, 256], strides = [1, 1]} : vector<8x384xf32> to vector<8x256xf32>
    %68 = arith.addf %66, %67 : vector<8x256xf32>
    %69 = arith.negf %68 : vector<8x256xf32>
    %70 = math.exp %69 : vector<8x256xf32>
    %cst_18 = arith.constant 1.000000e+00 : f32
    %71 = vector.broadcast %cst_18 : f32 to vector<8x256xf32>
    %72 = arith.addf %71, %70 : vector<8x256xf32>
    %73 = arith.divf %71, %72 : vector<8x256xf32>
    %74 = vector.extract_strided_slice %73 {offsets = [0, 0], sizes = [8, 128], strides = [1, 1]} : vector<8x256xf32> to vector<8x128xf32>
    %75 = vector.extract_strided_slice %73 {offsets = [0, 128], sizes = [8, 128], strides = [1, 1]} : vector<8x256xf32> to vector<8x128xf32>
    %76 = vector.extract_strided_slice %63 {offsets = [0, 256], sizes = [8, 128], strides = [1, 1]} : vector<8x384xf32> to vector<8x128xf32>
    %77 = vector.extract_strided_slice %65 {offsets = [0, 256], sizes = [8, 128], strides = [1, 1]} : vector<8x384xf32> to vector<8x128xf32>
    %78 = vector.broadcast %4 : vector<1x128xf32> to vector<8x128xf32>
    %79 = arith.addf %77, %78 : vector<8x128xf32>
    %80 = arith.mulf %74, %79 : vector<8x128xf32>
    %81 = arith.addf %76, %80 : vector<8x128xf32>
    %82 = math.tanh %81 : vector<8x128xf32>
    %cst_19 = arith.constant 1.000000e+00 : f32
    %83 = vector.broadcast %cst_19 : f32 to vector<8x128xf32>
    %84 = arith.subf %83, %75 : vector<8x128xf32>
    %85 = arith.mulf %84, %82 : vector<8x128xf32>
    %86 = arith.mulf %75, %61 : vector<8x128xf32>
    %87 = arith.addf %85, %86 : vector<8x128xf32>
    %88 = vector.extract_strided_slice %87 {offsets = [3, 0], sizes = [1, 128], strides = [1, 1]} : vector<8x128xf32> to vector<1x128xf32>
    %89 = vector.extract_strided_slice %9 {offsets = [24, 0], sizes = [8, 384], strides = [1, 1]} : vector<48x384xf32> to vector<8x384xf32>
    %90 = arith.truncf %87 : vector<8x128xf32> to vector<8x128xbf16>
    %cst_20 = arith.constant dense<0.000000e+00> : vector<8x384xf32>
    %91 = tpu.matmul %90, %1, %cst_20 {dimension_numbers = #tpu.dot_dimension_numbers<[1], [0], [0], [1], [0, 0, 1, 1], [], []>} : vector<8x128xbf16>, vector<128x384xbf16>, vector<8x384xf32> -> vector<8x384xf32>
    %92 = vector.extract_strided_slice %89 {offsets = [0, 0], sizes = [8, 256], strides = [1, 1]} : vector<8x384xf32> to vector<8x256xf32>
    %93 = vector.extract_strided_slice %91 {offsets = [0, 0], sizes = [8, 256], strides = [1, 1]} : vector<8x384xf32> to vector<8x256xf32>
    %94 = arith.addf %92, %93 : vector<8x256xf32>
    %95 = arith.negf %94 : vector<8x256xf32>
    %96 = math.exp %95 : vector<8x256xf32>
    %cst_21 = arith.constant 1.000000e+00 : f32
    %97 = vector.broadcast %cst_21 : f32 to vector<8x256xf32>
    %98 = arith.addf %97, %96 : vector<8x256xf32>
    %99 = arith.divf %97, %98 : vector<8x256xf32>
    %100 = vector.extract_strided_slice %99 {offsets = [0, 0], sizes = [8, 128], strides = [1, 1]} : vector<8x256xf32> to vector<8x128xf32>
    %101 = vector.extract_strided_slice %99 {offsets = [0, 128], sizes = [8, 128], strides = [1, 1]} : vector<8x256xf32> to vector<8x128xf32>
    %102 = vector.extract_strided_slice %89 {offsets = [0, 256], sizes = [8, 128], strides = [1, 1]} : vector<8x384xf32> to vector<8x128xf32>
    %103 = vector.extract_strided_slice %91 {offsets = [0, 256], sizes = [8, 128], strides = [1, 1]} : vector<8x384xf32> to vector<8x128xf32>
    %104 = vector.broadcast %4 : vector<1x128xf32> to vector<8x128xf32>
    %105 = arith.addf %103, %104 : vector<8x128xf32>
    %106 = arith.mulf %100, %105 : vector<8x128xf32>
    %107 = arith.addf %102, %106 : vector<8x128xf32>
    %108 = math.tanh %107 : vector<8x128xf32>
    %cst_22 = arith.constant 1.000000e+00 : f32
    %109 = vector.broadcast %cst_22 : f32 to vector<8x128xf32>
    %110 = arith.subf %109, %101 : vector<8x128xf32>
    %111 = arith.mulf %110, %108 : vector<8x128xf32>
    %112 = arith.mulf %101, %87 : vector<8x128xf32>
    %113 = arith.addf %111, %112 : vector<8x128xf32>
    %114 = vector.extract_strided_slice %113 {offsets = [3, 0], sizes = [1, 128], strides = [1, 1]} : vector<8x128xf32> to vector<1x128xf32>
    %115 = vector.extract_strided_slice %9 {offsets = [32, 0], sizes = [8, 384], strides = [1, 1]} : vector<48x384xf32> to vector<8x384xf32>
    %116 = arith.truncf %113 : vector<8x128xf32> to vector<8x128xbf16>
    %cst_23 = arith.constant dense<0.000000e+00> : vector<8x384xf32>
    %117 = tpu.matmul %116, %1, %cst_23 {dimension_numbers = #tpu.dot_dimension_numbers<[1], [0], [0], [1], [0, 0, 1, 1], [], []>} : vector<8x128xbf16>, vector<128x384xbf16>, vector<8x384xf32> -> vector<8x384xf32>
    %118 = vector.extract_strided_slice %115 {offsets = [0, 0], sizes = [8, 256], strides = [1, 1]} : vector<8x384xf32> to vector<8x256xf32>
    %119 = vector.extract_strided_slice %117 {offsets = [0, 0], sizes = [8, 256], strides = [1, 1]} : vector<8x384xf32> to vector<8x256xf32>
    %120 = arith.addf %118, %119 : vector<8x256xf32>
    %121 = arith.negf %120 : vector<8x256xf32>
    %122 = math.exp %121 : vector<8x256xf32>
    %cst_24 = arith.constant 1.000000e+00 : f32
    %123 = vector.broadcast %cst_24 : f32 to vector<8x256xf32>
    %124 = arith.addf %123, %122 : vector<8x256xf32>
    %125 = arith.divf %123, %124 : vector<8x256xf32>
    %126 = vector.extract_strided_slice %125 {offsets = [0, 0], sizes = [8, 128], strides = [1, 1]} : vector<8x256xf32> to vector<8x128xf32>
    %127 = vector.extract_strided_slice %125 {offsets = [0, 128], sizes = [8, 128], strides = [1, 1]} : vector<8x256xf32> to vector<8x128xf32>
    %128 = vector.extract_strided_slice %115 {offsets = [0, 256], sizes = [8, 128], strides = [1, 1]} : vector<8x384xf32> to vector<8x128xf32>
    %129 = vector.extract_strided_slice %117 {offsets = [0, 256], sizes = [8, 128], strides = [1, 1]} : vector<8x384xf32> to vector<8x128xf32>
    %130 = vector.broadcast %4 : vector<1x128xf32> to vector<8x128xf32>
    %131 = arith.addf %129, %130 : vector<8x128xf32>
    %132 = arith.mulf %126, %131 : vector<8x128xf32>
    %133 = arith.addf %128, %132 : vector<8x128xf32>
    %134 = math.tanh %133 : vector<8x128xf32>
    %cst_25 = arith.constant 1.000000e+00 : f32
    %135 = vector.broadcast %cst_25 : f32 to vector<8x128xf32>
    %136 = arith.subf %135, %127 : vector<8x128xf32>
    %137 = arith.mulf %136, %134 : vector<8x128xf32>
    %138 = arith.mulf %127, %113 : vector<8x128xf32>
    %139 = arith.addf %137, %138 : vector<8x128xf32>
    %140 = vector.extract_strided_slice %139 {offsets = [3, 0], sizes = [1, 128], strides = [1, 1]} : vector<8x128xf32> to vector<1x128xf32>
    %141 = vector.extract_strided_slice %9 {offsets = [40, 0], sizes = [8, 384], strides = [1, 1]} : vector<48x384xf32> to vector<8x384xf32>
    %142 = arith.truncf %139 : vector<8x128xf32> to vector<8x128xbf16>
    %cst_26 = arith.constant dense<0.000000e+00> : vector<8x384xf32>
    %143 = tpu.matmul %142, %1, %cst_26 {dimension_numbers = #tpu.dot_dimension_numbers<[1], [0], [0], [1], [0, 0, 1, 1], [], []>} : vector<8x128xbf16>, vector<128x384xbf16>, vector<8x384xf32> -> vector<8x384xf32>
    %144 = vector.extract_strided_slice %141 {offsets = [0, 0], sizes = [8, 256], strides = [1, 1]} : vector<8x384xf32> to vector<8x256xf32>
    %145 = vector.extract_strided_slice %143 {offsets = [0, 0], sizes = [8, 256], strides = [1, 1]} : vector<8x384xf32> to vector<8x256xf32>
    %146 = arith.addf %144, %145 : vector<8x256xf32>
    %147 = arith.negf %146 : vector<8x256xf32>
    %148 = math.exp %147 : vector<8x256xf32>
    %cst_27 = arith.constant 1.000000e+00 : f32
    %149 = vector.broadcast %cst_27 : f32 to vector<8x256xf32>
    %150 = arith.addf %149, %148 : vector<8x256xf32>
    %151 = arith.divf %149, %150 : vector<8x256xf32>
    %152 = vector.extract_strided_slice %151 {offsets = [0, 0], sizes = [8, 128], strides = [1, 1]} : vector<8x256xf32> to vector<8x128xf32>
    %153 = vector.extract_strided_slice %151 {offsets = [0, 128], sizes = [8, 128], strides = [1, 1]} : vector<8x256xf32> to vector<8x128xf32>
    %154 = vector.extract_strided_slice %141 {offsets = [0, 256], sizes = [8, 128], strides = [1, 1]} : vector<8x384xf32> to vector<8x128xf32>
    %155 = vector.extract_strided_slice %143 {offsets = [0, 256], sizes = [8, 128], strides = [1, 1]} : vector<8x384xf32> to vector<8x128xf32>
    %156 = vector.broadcast %4 : vector<1x128xf32> to vector<8x128xf32>
    %157 = arith.addf %155, %156 : vector<8x128xf32>
    %158 = arith.mulf %152, %157 : vector<8x128xf32>
    %159 = arith.addf %154, %158 : vector<8x128xf32>
    %160 = math.tanh %159 : vector<8x128xf32>
    %cst_28 = arith.constant 1.000000e+00 : f32
    %161 = vector.broadcast %cst_28 : f32 to vector<8x128xf32>
    %162 = arith.subf %161, %153 : vector<8x128xf32>
    %163 = arith.mulf %162, %160 : vector<8x128xf32>
    %164 = arith.mulf %153, %139 : vector<8x128xf32>
    %165 = arith.addf %163, %164 : vector<8x128xf32>
    %166 = vector.extract_strided_slice %165 {offsets = [3, 0], sizes = [1, 128], strides = [1, 1]} : vector<8x128xf32> to vector<1x128xf32>
    %c0_29 = arith.constant 0 : index
    %c0_30 = arith.constant 0 : index
    %167 = vector.load %arg5[%c0_29, %c0_30] : memref<8x128xf32, #tpu.memory_space<vmem>>, vector<8x128xf32>
    tpu.vector_store %arg5[%c0_29, %c0_30], %165 {strides = array<i32>} : memref<8x128xf32, #tpu.memory_space<vmem>>, vector<8x128xf32>,
    %168 = tpu.concatenate %36, %62, %88, %114, %140, %166 in 0 : vector<1x128xf32>, vector<1x128xf32>, vector<1x128xf32>, vector<1x128xf32>, vector<1x128xf32>, vector<1x128xf32> -> vector<6x128xf32>
    %169 = arith.truncf %168 : vector<6x128xf32> to vector<6x128xbf16>
    %cst_31 = arith.constant dense<0.000000e+00> : vector<6x128xf32>
    %170 = tpu.matmul %169, %2, %cst_31 {dimension_numbers = #tpu.dot_dimension_numbers<[1], [0], [0], [1], [0, 0, 1, 1], [], []>} : vector<6x128xbf16>, vector<128x128xbf16>, vector<6x128xf32> -> vector<6x128xf32>
    %171 = vector.broadcast %5 : vector<1x128xf32> to vector<6x128xf32>
    %172 = arith.addf %170, %171 : vector<6x128xf32>
    %c0_32 = arith.constant 0 : index
    %c0_33 = arith.constant 0 : index
    %173 = vector.load %arg4[%c0_32, %c0_33] : memref<6x128xf32, #tpu.memory_space<vmem>>, vector<6x128xf32>
    tpu.vector_store %arg4[%c0_32, %c0_33], %172 {strides = array<i32>} : memref<6x128xf32, #tpu.memory_space<vmem>>, vector<6x128xf32>,
    return
  }
}

</mosaic_0001>

<bundles_post_ra>
// kernel: tpu_custom_call.1
= control target key start
LH: loop header
LB: loop body
LE: loop exit
PB: predicated region body
PF: predicated region fallthrough
CT: control target
= control target key end

     0   :  { %11 = vsyncpa [#allocation3], 0  ;;  %s2106_s0 = inlined_call_operand.vmem [shape: bf16[48,8], index: 0, kind: input, shape index: {}]   ;;  %s2107_s1 = inlined_call_operand.hbm [shape: bf16[272,384], index: 1, kind: input, shape index: {}]   ;;  %s2108_s2 = inlined_call_operand.vmem [shape: f32[8,384], index: 2, kind: input, shape index: {}]   ;;  %s2109_s3 = inlined_call_operand.vmem [shape: f32[8,128], index: 3, kind: input, shape index: {}]   ;;  %s2110_s4 = inlined_call_operand.hbm [shape: f32[6,128], index: 4, kind: output, shape index: {0}]   ;;  %s2111_s5 = inlined_call_operand.hbm [shape: f32[8,128], index: 5, kind: output, shape index: {1}]  }
   0x1   :  { %12 = vsyncpa [#allocation4], 0 }
   0x2   :  { %13 = vsyncpa [#allocation7], 0  ;;  %s1635_s18 = smov [#allocation2]   ;;  %s1563_s22 = scalar_lea.hbm %s2107_s1, 6528 }
   0x3   :  { %s21_s19 = sshll.u32 %s1635_s18, 4  ;;  %p1564_p0 = scmp.ne.s32.totalorder %s2107_s1, %s1563_s22  ;;  %s22_s19 = int_to_ptr.vmem [resolvable:$true] %s21_s19 }
   0x4   :  { %p1567_p1 = scmp.lt.u32.totalorder %s1563_s22, %s2107_s1 }
   0x6   :  { %p1569_p2 = pnand %p1567_p1, %p1564_p0 }
   0x8   :  { %1572 = shalt.err (!%p1569_p2)
}
   0x9   :  { %s1573_s27 = scalar_lea.vmem %s22_s19, 6528  ;;  %p1578_p4 = scmp.lt.s32.totalorder %s22_s19, %s22_s19 }
   0xa   :  { %p1574_p3 = scmp.ne.s32.totalorder %s22_s19, %s1573_s27  ;;  %p1579_p5 = scmp.lt.s32.totalorder %s1573_s27, %s1573_s27 }
   0xc   :  { %p1580_p6 = por %p1579_p5, %p1578_p4 }
   0xe   :  { %p1581_p7 = pnand %p1580_p6, %p1574_p3 }
  0x10   :  { %1584 = shalt.err (!%p1581_p7)
}
  0x11   :  { %s1636_s28 = smov 192   ;;  %s1637_s29 = smov 12  }
  0x12   :  { %27 = dma.hbm_to_vmem [thread:$0]  %s2107_s1, 6528, %s22_s19, [#allocation3], %s1636_s28, %s1636_s28, %s1637_s29  }
  0x13   :  { %1629 = dma.done.wait [#allocation3], 6528  }
  0x14   :  { %1630 = vsyncadd [#allocation3], 4294960768  ;;  %v1638_v0 = vmov 0   ;;  %v36_v1 = vld [vmem:[#allocation2] sm:$0xff]  ;;  %vm144_vm0 = vcmask 1043456   ;;  %v1462_v6 = vld [vmem:[%s2106_s0] sm:$0xff]   ;;  %v96_v37 = vlaneseq }
  0x15   :  { %186 = vmatprep.mubr.bf16.mxu1 %v1638_v0  ;;  %436 = vmatprep.mubr.bf16.mxu0 %v1638_v0  ;;  %v1175_v2 = vcombine.high %v36_v1, %v36_v1  ;;  %v1687_v3 = vld [vmem:[#allocation2 + $0x1c] ss:$12 sps:$4 sm:$0xff]   ;;  %v1174_v4 = vcombine.low %v36_v1, %v36_v1  ;;  %v1689_v5 = vld [vmem:[#allocation2 + $0x18] ss:$12 sps:$4 sm:$0xff]   ;;  %v1697_v8 = vld [vmem:[#allocation2 + $0x34] ss:$12 sps:$4 sm:$0xff]  }
  0x16   :  { %404 = vmatprep.subr.bf16.mxu0 %v1687_v3  ;;  %vm134_vm1 = vcmask 64512   ;;  %v1465_v9 = vld [vmem:[#allocation2 + $0x8] ss:$0 sps:$4 sm:$0xff]   ;;  %v1700_v10 = vld [vmem:[#allocation2 + $0x30] ss:$12 sps:$4 sm:$0xff]   ;;  %v1639_v11 = vmov 0.0  }
  0x17   :  { %1177 = vmatprep.subr.msk.bf16.mxu1 %vm144_vm0, %v1175_v2  ;;  %v146_v7 = vsel %vm144_vm0, %v1174_v4, 0  ;;  %405 = vmatpush1.bf16.msra.mxu0 %v1689_v5  ;;  %v1704_v12 = vld [vmem:[#allocation2 + $0x4c] ss:$12 sps:$4 sm:$0xff]   ;;  %v152_v13 = vsel %vm144_vm0, %v1465_v9, 0  ;;  %v1709_v14 = vld [vmem:[#allocation2 + $0x48] ss:$12 sps:$4 sm:$0xff]  }
  0x18   :  { %155 = vmatpush1.bf16.msra.mxu1 %v146_v7  ;;  %406 = vmatprep.subr.bf16.mxu0 %v1697_v8  ;;  %v1713_v15 = vld [vmem:[#allocation2 + $0x64] ss:$12 sps:$4 sm:$0xff]   ;;  %v1720_v17 = vld [vmem:[#allocation2 + $0x60] ss:$12 sps:$4 sm:$0xff]   ;;  %v1723_v18 = vld [vmem:[#allocation2 + $0x7c] ss:$12 sps:$4 sm:$0xff]  }
  0x19   :  { %1295 = vmatprep.subr.bf16.mxu1 %v1639_v11  ;;  %v1470_v16 = vld [vmem:[%s2106_s0 + $0x8] sm:$0xff]   ;;  %v1727_v19 = vld [vmem:[#allocation2 + $0x78] ss:$12 sps:$4 sm:$0xff]   ;;  %vm1640_vm2 = vmmov 0   ;;  %v1751_v26 = vld [vmem:[#allocation2 + $0x20] ss:$12 sps:$4 sm:$0xff]  }
  0x1a   :  { %v1731_v20 = vld [vmem:[#allocation2 + $0x94] ss:$12 sps:$4 sm:$0xff]   ;;  %v1477_v21 = vld [vmem:[%s2106_s0 + $0x10] sm:$0xff]   ;;  %v1745_v25 = vld [vmem:[#allocation2 + $0xc4] ss:$12 sps:$4 sm:$0xff]   ;;  %v97_v38 = vshrl.u32 %v96_v37, 7 }
  0x1b   :  { %1178 = vmatmul.mubr.msk.bf16.vlgmr.msra.gmra.mrb[0].mxu1 %vm134_vm1, %v1462_v6  ;;  %407 = vmatpush1.bf16.msra.mxu0 %v1700_v10  ;;  %v1737_v22 = vld [vmem:[#allocation2 + $0x90] ss:$12 sps:$4 sm:$0xff]   ;;  %v1740_v23 = vld [vmem:[#allocation2 + $0xac] ss:$12 sps:$4 sm:$0xff]   ;;  %v1743_v24 = vld [vmem:[#allocation2 + $0xa8] ss:$12 sps:$4 sm:$0xff]  }
  0x1c   :  { %1296 = vmatpush3.bf16.msra.mxu1 %v152_v13  ;;  %408 = vmatprep.subr.bf16.mxu0 %v1704_v12  ;;  %v1753_v27 = vld [vmem:[#allocation2 + $0xc0] ss:$12 sps:$4 sm:$0xff]   ;;  %v1767_v30 = vld [vmem:[#allocation2 + $0x38] ss:$12 sps:$4 sm:$0xff]   ;;  %v1774_v31 = vld [vmem:[#allocation2 + $0x50] ss:$12 sps:$4 sm:$0xff]  }
  0x1d   :  { %196 = vmatprep.mubr.bf16.mxu1 %v1638_v0  ;;  %1309 = vmatprep.subr.bf16.mxu1 %v1639_v11  ;;  %v1758_v28 = vld [vmem:[%s2109_s3] sm:$0xff]  ;;  %v1797_v34 = vld [vmem:[#allocation2 + $0x98] ss:$12 sps:$4 sm:$0xff]   ;;  %v1805_v35 = vld [vmem:[#allocation2 + $0xb0] ss:$12 sps:$4 sm:$0xff]   ;;  %v98_v39 = vsub.s32 0, %v97_v38 }
  0x1e   :  { %v275_v29 = vpack.c.bf16 %v1758_v28, %v1758_v28  ;;  %v1782_v32 = vld [vmem:[#allocation2 + $0x68] ss:$12 sps:$4 sm:$0xff]   ;;  %v1790_v33 = vld [vmem:[#allocation2 + $0x80] ss:$12 sps:$4 sm:$0xff]   ;;  %v102_v41 = vsub.s32 1, %v97_v38  ;;  %v106_v4 = vsub.s32 2, %v97_v38 }
  0x1f   :  { %409 = vmatpush1.bf16.msra.mxu0 %v1709_v14  ;;  %v1811_v36 = vld [vmem:[#allocation2 + $0xc8] ss:$12 sps:$4 sm:$0xff]   ;;  %vm1043_vm3 = vcmask 1040384   ;;  %vm1045_vm4 = vcmask 1041408   ;;  %vm1047_vm5 = vcmask 1042432   ;;  %vm1050_vm6 = vcmask 1044480  }
  0x20   :  { %410 = vmatprep.subr.bf16.mxu0 %v1713_v15  ;;  %v86_v40 = vld [vmem:[%s2108_s2] ss:$8 sm:$0x7]  ;;  %s1641_s16 = smov [#allocation6]  }
  0x21   :  { %v99_v43 = vrot.slane %v86_v40, %v98_v39  ;;  %v103_v45 = vrot.slane %v86_v40, %v102_v41  ;;  %v107_v7 = vrot.slane %v86_v40, %v106_v4  ;;  %s1158_s17 = sshll.u32 %s1641_s16, 4  ;;  %s1159_s17 = int_to_ptr.vmem [resolvable:$true] %s1158_s17 }
  0x22   :  { %s1585_s18 = scalar_lea.vmem %s1159_s17, 128  ;;  %p1590_p9 = scmp.lt.s32.totalorder %s1159_s17, %s1159_s17 }
  0x23   :  { %1179 = vmatmul.mubr.msk.bf16.gmra.mrb[4].mxu1 %vm134_vm1, %v1470_v16  ;;  %411 = vmatpush1.bf16.msra.mxu0 %v1720_v17  ;;  %p1586_p8 = scmp.ne.s32.totalorder %s1159_s17, %s1585_s18  ;;  %p1591_p10 = scmp.lt.s32.totalorder %s1585_s18, %s1585_s18 }
  0x24   :  { %206 = vmatprep.mubr.bf16.mxu1 %v1638_v0  ;;  %412 = vmatprep.subr.bf16.mxu0 %v1723_v18 }
  0x25   :  { %p1592_p11 = por %p1591_p10, %p1590_p9 }
  0x27   :  { %413 = vmatpush1.bf16.msra.mxu0 %v1727_v19  ;;  %p1593_p12 = pnand %p1592_p11, %p1586_p8 }
  0x28   :  { %414 = vmatprep.subr.bf16.mxu0 %v1731_v20 }
  0x2b   :  { %1180 = vmatmul.mubr.msk.bf16.gmra.mrb[8].mxu1 %vm134_vm1, %v1477_v21  ;;  %415 = vmatpush1.bf16.msra.mxu0 %v1737_v22 }
  0x2c   :  { %1297 = vmatprep.mubr.msk.bf16.mxu1 %vm1640_vm2, %v1639_v11  ;;  %416 = vmatprep.subr.bf16.mxu0 %v1740_v23 }
  0x2f   :  { %417 = vmatpush1.bf16.msra.mxu0 %v1743_v24 }
  0x30   :  { %418 = vmatprep.subr.bf16.mxu0 %v1745_v25 }
  0x33   :  { %1298 = vmatmul.mubr.msk.bf16.vlgmr.msra.gmra.mrb[12].mxu1 %vm134_vm1, %v1462_v6  ;;  %419 = vmatpush1.bf16.msra.mxu0 %v1753_v27 }
  0x34   :  { %1310 = vmatpush3.bf16.msra.mxu1 %v1751_v26  ;;  %1301 = vmatprep.mubr.msk.bf16.mxu1 %vm1640_vm2, %v1639_v11 }
  0x35   :  { %1311 = vmatprep.subr.bf16.mxu1 %v1639_v11  ;;  %508 = vmatprep.subr.bf16.mxu0 %v1687_v3 }
  0x36   :  { %437 = vmatmul.mubr.bf16.vlgmr.msra.gmra.mrb[0].mxu0 %v275_v29 }
  0x37   :  { %509 = vmatpush1.bf16.msra.mxu0 %v1689_v5  ;;  %540 = vmatprep.mubr.bf16.mxu0 %v1638_v0 }
  0x38   :  { %1312 = vmatpush3.bf16.msra.mxu1 %v1767_v30  ;;  %510 = vmatprep.subr.bf16.mxu0 %v1697_v8 }
  0x39   :  { %1313 = vmatprep.subr.bf16.mxu1 %v1639_v11 }
  0x3b   :  { %1302 = vmatmul.mubr.msk.bf16.gmra.mrb[16].mxu1 %vm134_vm1, %v1470_v16  ;;  %511 = vmatpush1.bf16.msra.mxu0 %v1700_v10 }
  0x3c   :  { %1314 = vmatpush3.bf16.msra.mxu1 %v1774_v31  ;;  %1305 = vmatprep.mubr.msk.bf16.mxu1 %vm1640_vm2, %v1639_v11 }
  0x3d   :  { %1315 = vmatprep.subr.bf16.mxu1 %v1639_v11  ;;  %512 = vmatprep.subr.bf16.mxu0 %v1704_v12 }
  0x3f   :  { %513 = vmatpush1.bf16.msra.mxu0 %v1709_v14 }
  0x40   :  { %1316 = vmatpush3.bf16.msra.mxu1 %v1782_v32  ;;  %514 = vmatprep.subr.bf16.mxu0 %v1713_v15 }
  0x41   :  { %1317 = vmatprep.subr.bf16.mxu1 %v1639_v11 }
  0x43   :  { %1306 = vmatmul.mubr.msk.bf16.gmra.mrb[20].mxu1 %vm134_vm1, %v1477_v21  ;;  %515 = vmatpush1.bf16.msra.mxu0 %v1720_v17 }
  0x44   :  { %1318 = vmatpush3.bf16.msra.mxu1 %v1790_v33  ;;  %1325 = vmatprep.mubr.msk.bf16.mxu1 %vm1640_vm2, %v1639_v11 }
  0x45   :  { %1319 = vmatprep.subr.bf16.mxu1 %v1639_v11  ;;  %516 = vmatprep.subr.bf16.mxu0 %v1723_v18 }
  0x47   :  { %517 = vmatpush1.bf16.msra.mxu0 %v1727_v19 }
  0x48   :  { %1320 = vmatpush3.bf16.msra.mxu1 %v1797_v34  ;;  %518 = vmatprep.subr.bf16.mxu0 %v1731_v20 }
  0x49   :  { %1321 = vmatprep.subr.bf16.mxu1 %v1639_v11 }
  0x4b   :  { %519 = vmatpush1.bf16.msra.mxu0 %v1737_v22 }
  0x4c   :  { %1322 = vmatpush3.bf16.msra.mxu1 %v1805_v35  ;;  %520 = vmatprep.subr.bf16.mxu0 %v1740_v23 }
  0x4d   :  { %1323 = vmatprep.subr.bf16.mxu1 %v1639_v11 }
  0x4f   :  { %521 = vmatpush1.bf16.msra.mxu0 %v1743_v24 }
  0x50   :  { %1324 = vmatpush3.bf16.msra.mxu1 %v1811_v36  ;;  %522 = vmatprep.subr.bf16.mxu0 %v1745_v25 }
  0x51   :  { %1329 = vmatprep.subr.bf16.mxu1 %v1639_v11 }
  0x53   :  { %1326 = vmatmul.mubr.bf16.vlgmr.msra.gmra.mrb[24].mxu1 %v275_v29  ;;  %523 = vmatpush1.bf16.msra.mxu0 %v1753_v27 }
  0x54   :  { %1330 = vmatpush3.bf16.msra.mxu1 %v1751_v26  ;;  %1345 = vmatprep.mubr.msk.bf16.mxu1 %vm1640_vm2, %v1639_v11 }
  0x55   :  { %1331 = vmatprep.subr.bf16.mxu1 %v1639_v11  ;;  %612 = vmatprep.subr.bf16.mxu0 %v1687_v3 }
  0x58   :  { %1332 = vmatpush3.bf16.msra.mxu1 %v1767_v30 }
  0x59   :  { %1333 = vmatprep.subr.bf16.mxu1 %v1639_v11 }
  0x5c   :  { %1334 = vmatpush3.bf16.msra.mxu1 %v1774_v31 }
  0x5d   :  { %1335 = vmatprep.subr.bf16.mxu1 %v1639_v11 }
  0x60   :  { %1336 = vmatpush3.bf16.msra.mxu1 %v1782_v32 }
  0x61   :  { %1337 = vmatprep.subr.bf16.mxu1 %v1639_v11 }
  0x64   :  { %1338 = vmatpush3.bf16.msra.mxu1 %v1790_v33 }
  0x65   :  { %1339 = vmatprep.subr.bf16.mxu1 %v1639_v11 }
  0x68   :  { %1340 = vmatpush3.bf16.msra.mxu1 %v1797_v34 }
  0x69   :  { %1341 = vmatprep.subr.bf16.mxu1 %v1639_v11 }
  0x6c   :  { %1342 = vmatpush3.bf16.msra.mxu1 %v1805_v35 }
  0x6d   :  { %1343 = vmatprep.subr.bf16.mxu1 %v1639_v11 }
  0x70   :  { %1344 = vmatpush3.bf16.msra.mxu1 %v1811_v36 }
  0x71   :  { %1349 = vmatprep.subr.bf16.mxu1 %v1639_v11 }
  0xee   :  { %v188_v42 = vpop.f32.mrb[0].mxu1 }
  0xef   :  { %v190_v44 = vpop.f32.mrb[1].mxu1  ;;  %v189_v16 = vadd.f32 %v188_v42, %v99_v43 }
  0xf0   :  { %v192_v46 = vpop.f32.mrb[2].mxu1  ;;  %v191_v37 = vadd.f32 %v190_v44, %v103_v45 }
  0xf1   :  { %v1843_v47 = vadd.f32 %v192_v46, %v99_v43  ;;  %v194_v48 = vpop.f32.mrb[3].mxu1 }
  0xf2   :  { %v1845_v49 = vadd.f32 %v194_v48, %v103_v45 }
  0xf6   :  { %v198_v50 = vpop.f32.mrb[4].mxu1 }
  0xf7   :  { %v1847_v51 = vadd.f32 %v198_v50, %v99_v43  ;;  %v200_v52 = vpop.f32.mrb[5].mxu1 }
  0xf8   :  { %v1849_v53 = vadd.f32 %v200_v52, %v103_v45  ;;  %v202_v54 = vpop.f32.mrb[6].mxu1 }
  0xf9   :  { %v1851_v55 = vadd.f32 %v202_v54, %v99_v43  ;;  %v204_v56 = vpop.f32.mrb[7].mxu1 }
  0xfa   :  { %v1853_v57 = vadd.f32 %v204_v56, %v103_v45 }
  0xfe   :  { %v208_v58 = vpop.f32.mrb[8].mxu1 }
  0xff   :  { %v1855_v59 = vadd.f32 %v208_v58, %v99_v43  ;;  %v210_v60 = vpop.f32.mrb[9].mxu1 }
 0x100   :  { %v1857_v61 = vadd.f32 %v210_v60, %v103_v45  ;;  %v212_v62 = vpop.f32.mrb[10].mxu1 }
 0x101   :  { %v1859_v63 = vadd.f32 %v212_v62, %v99_v43  ;;  %v214_v1 = vpop.f32.mrb[11].mxu1 }
 0x102   :  { %v1861_v2 = vadd.f32 %v214_v1, %v103_v45 }
 0x106   :  { %v251_v6 = vpop.f32.mrb[12].mxu1 }
 0x107   :  { %v1299_v9 = vpop.f32.mrb[13].mxu1 }
 0x108   :  { %v254_v13 = vpop.f32.mrb[14].mxu1 }
 0x109   :  { %v1863_v21 = vadd.f32 %v254_v13, %v107_v7  ;;  %v1300_v29 = vpop.f32.mrb[15].mxu1  ;;  %v438_v39 = vpop.f32.mrb[0].mxu0 }
 0x10a   :  { %v485_v41 = vadd.f32 %v438_v39, %v189_v16  ;;  %v440_v46 = vpop.f32.mrb[1].mxu0 }
 0x10b   :  { %v486_v48 = vadd.f32 %v440_v46, %v191_v37  ;;  %v442_v50 = vpop.f32.mrb[2].mxu0  ;;  %v1876_v37 = vld [vmem:[%s2108_s2 + $0x1] ss:$0 sm:$0xff] }
 0x10c   :  { %v1208_v52 = vmul.f32 -1.442695, %v485_v41  ;;  %v443_v54 = vpop.f32.mrb[3].mxu0 }
 0x10d   :  { %v1209_v43 = vmul.f32 -1.442695, %v486_v48  ;;  %v252_v54 = vadd.f32 %v251_v6, %v107_v7 }
 0x10e   :  { %v259_v56 = vpop.f32.mrb[16].mxu1  ;;  %1503 = vpow2.f32 %v1208_v52 }
 0x10f   :  { %v1865_v58 = vadd.f32 %v259_v56, %v107_v7  ;;  %v1303_v38 = vpop.f32.mrb[17].mxu1  ;;  %1505 = vpow2.f32 %v1209_v43 }
 0x110   :  { %v262_v40 = vpop.f32.mrb[18].mxu1 }
 0x111   :  { %v1867_v60 = vadd.f32 %v262_v40, %v107_v7  ;;  %v1304_v42 = vpop.f32.mrb[19].mxu1 }
 0x116   :  { %v267_v62 = vpop.f32.mrb[20].mxu1 }
 0x117   :  { %v1869_v1 = vadd.f32 %v267_v62, %v107_v7  ;;  %v1307_v44 = vpop.f32.mrb[21].mxu1 }
 0x118   :  { %v270_v45 = vpop.f32.mrb[22].mxu1  ;;  %v1504_v4 = vpop.eup %1503 }
 0x119   :  { %v1871_v9 = vadd.f32 %v270_v45, %v107_v7  ;;  %v1308_v13 = vpop.f32.mrb[23].mxu1  ;;  %v493_v16 = vadd.f32 1.0, %v1504_v4  ;;  %v1506_v29 = vpop.eup %1505 }
 0x11a   :  { %v494_v39 = vadd.f32 1.0, %v1506_v29 }
 0x11b   :  { %1507 = vrcp.f32 %v493_v16 }
 0x11c   :  { %1509 = vrcp.f32 %v494_v39 }
 0x125   :  { %v1508_v50 = vpop.eup %1507 }
 0x126   :  { %v479_v41 = vpop.f32.mrb[24].mxu1  ;;  %v1510_v42 = vpop.eup %1509 }
 0x127   :  { %v499_v46 = vadd.f32 %v479_v41, %v1876_v37  ;;  %v1327_v48 = vpop.f32.mrb[25].mxu1  ;;  %v503_v43 = vsub.f32 1.0, %v1510_v42  ;;  %v505_v45 = vmul.f32 %v1510_v42, %v1758_v28 }
 0x128   :  { %v482_v52 = vpop.f32.mrb[26].mxu1 }
 0x129   :  { %v500_v56 = vmul.f32 %v1508_v50, %v499_v46  ;;  %v1328_v38 = vpop.f32.mrb[27].mxu1 }
 0x12b   :  { %v501_v40 = vadd.f32 %v500_v56, %v252_v54 }
 0x12d   :  { %1511 = vtanh.f32 %v501_v40 }
 0x137   :  { %v1512_v62 = vpop.eup %1511 }
 0x138   :  { %v504_v44 = vmul.f32 %v1512_v62, %v503_v43 }
 0x13a   :  { %v1880_v4 = vadd.f32 %v505_v45, %v504_v44 }
 0x13c   :  { %v507_v13 = vpack.c.bf16 %v1880_v4, %v1880_v4 }
 0x13e   :  { %541 = vmatmul.mubr.bf16.vlgmr.msra.gmra.mrb[4].mxu0 %v507_v13  ;;  %1346 = vmatmul.mubr.bf16.vlgmr.msra.gmra.mrb[28].mxu1 %v507_v13 }
 0x13f   :  { %613 = vmatpush1.bf16.msra.mxu0 %v1689_v5  ;;  %1350 = vmatpush3.bf16.msra.mxu1 %v1751_v26 }
 0x140   :  { %614 = vmatprep.subr.bf16.mxu0 %v1697_v8  ;;  %1351 = vmatprep.subr.bf16.mxu1 %v1639_v11 }
 0x141   :  { %644 = vmatprep.mubr.bf16.mxu0 %v1638_v0  ;;  %1365 = vmatprep.mubr.msk.bf16.mxu1 %vm1640_vm2, %v1639_v11 }
 0x143   :  { %615 = vmatpush1.bf16.msra.mxu0 %v1700_v10  ;;  %1352 = vmatpush3.bf16.msra.mxu1 %v1767_v30 }
 0x144   :  { %616 = vmatprep.subr.bf16.mxu0 %v1704_v12  ;;  %1353 = vmatprep.subr.bf16.mxu1 %v1639_v11 }
 0x147   :  { %617 = vmatpush1.bf16.msra.mxu0 %v1709_v14  ;;  %1354 = vmatpush3.bf16.msra.mxu1 %v1774_v31 }
 0x148   :  { %618 = vmatprep.subr.bf16.mxu0 %v1713_v15  ;;  %1355 = vmatprep.subr.bf16.mxu1 %v1639_v11 }
 0x14b   :  { %619 = vmatpush1.bf16.msra.mxu0 %v1720_v17  ;;  %1356 = vmatpush3.bf16.msra.mxu1 %v1782_v32 }
 0x14c   :  { %620 = vmatprep.subr.bf16.mxu0 %v1723_v18  ;;  %1357 = vmatprep.subr.bf16.mxu1 %v1639_v11 }
 0x14f   :  { %621 = vmatpush1.bf16.msra.mxu0 %v1727_v19  ;;  %1358 = vmatpush3.bf16.msra.mxu1 %v1790_v33 }
 0x150   :  { %622 = vmatprep.subr.bf16.mxu0 %v1731_v20  ;;  %1359 = vmatprep.subr.bf16.mxu1 %v1639_v11 }
 0x153   :  { %623 = vmatpush1.bf16.msra.mxu0 %v1737_v22  ;;  %1360 = vmatpush3.bf16.msra.mxu1 %v1797_v34 }
 0x154   :  { %624 = vmatprep.subr.bf16.mxu0 %v1740_v23  ;;  %1361 = vmatprep.subr.bf16.mxu1 %v1639_v11 }
 0x157   :  { %625 = vmatpush1.bf16.msra.mxu0 %v1743_v24  ;;  %1362 = vmatpush3.bf16.msra.mxu1 %v1805_v35 }
 0x158   :  { %626 = vmatprep.subr.bf16.mxu0 %v1745_v25  ;;  %1363 = vmatprep.subr.bf16.mxu1 %v1639_v11 }
 0x15b   :  { %627 = vmatpush1.bf16.msra.mxu0 %v1753_v27  ;;  %1364 = vmatpush3.bf16.msra.mxu1 %v1811_v36 }
 0x15c   :  { %716 = vmatprep.subr.bf16.mxu0 %v1687_v3  ;;  %1369 = vmatprep.subr.bf16.mxu1 %v1639_v11 }
 0x211   :  { %v542_v28 = vpop.f32.mrb[4].mxu0  ;;  %v583_v6 = vpop.f32.mrb[28].mxu1 }
 0x212   :  { %v589_v7 = vadd.f32 %v542_v28, %v1843_v47  ;;  %v544_v16 = vpop.f32.mrb[5].mxu0  ;;  %v1347_v29 = vpop.f32.mrb[29].mxu1  ;;  %v603_v43 = vadd.f32 %v583_v6, %v1876_v37 }
 0x213   :  { %v590_v39 = vadd.f32 %v544_v16, %v1845_v49  ;;  %v546_v41 = vpop.f32.mrb[6].mxu0  ;;  %v586_v46 = vpop.f32.mrb[30].mxu1 }
 0x214   :  { %v1210_v48 = vmul.f32 -1.442695, %v589_v7  ;;  %v547_v50 = vpop.f32.mrb[7].mxu0  ;;  %v1348_v52 = vpop.f32.mrb[31].mxu1 }
 0x215   :  { %v1211_v54 = vmul.f32 -1.442695, %v590_v39 }
 0x216   :  { %1513 = vpow2.f32 %v1210_v48 }
 0x217   :  { %1515 = vpow2.f32 %v1211_v54 }
 0x220   :  { %v1514_v56 = vpop.eup %1513 }
 0x221   :  { %v597_v38 = vadd.f32 1.0, %v1514_v56  ;;  %v1516_v40 = vpop.eup %1515 }
 0x222   :  { %v598_v42 = vadd.f32 1.0, %v1516_v40 }
 0x223   :  { %1517 = vrcp.f32 %v597_v38 }
 0x224   :  { %1519 = vrcp.f32 %v598_v42 }
 0x22d   :  { %v1518_v47 = vpop.eup %1517 }
 0x22e   :  { %v604_v62 = vmul.f32 %v1518_v47, %v603_v43  ;;  %v1520_v44 = vpop.eup %1519 }
 0x22f   :  { %v607_v45 = vsub.f32 1.0, %v1520_v44  ;;  %v609_v7 = vmul.f32 %v1520_v44, %v1880_v4 }
 0x230   :  { %v605_v49 = vadd.f32 %v604_v62, %v1863_v21 }
 0x232   :  { %1521 = vtanh.f32 %v605_v49 }
 0x23c   :  { %v1522_v13 = vpop.eup %1521 }
 0x23d   :  { %v608_v28 = vmul.f32 %v1522_v13, %v607_v45 }
 0x23f   :  { %v1924_v16 = vadd.f32 %v609_v7, %v608_v28 }
 0x241   :  { %v611_v29 = vpack.c.bf16 %v1924_v16, %v1924_v16 }
 0x243   :  { %645 = vmatmul.mubr.bf16.vlgmr.msra.gmra.mrb[8].mxu0 %v611_v29  ;;  %1366 = vmatmul.mubr.bf16.vlgmr.msra.gmra.mrb[32].mxu1 %v611_v29 }
 0x244   :  { %717 = vmatpush1.bf16.msra.mxu0 %v1689_v5  ;;  %1370 = vmatpush3.bf16.msra.mxu1 %v1751_v26 }
 0x245   :  { %718 = vmatprep.subr.bf16.mxu0 %v1697_v8  ;;  %1371 = vmatprep.subr.bf16.mxu1 %v1639_v11 }
 0x246   :  { %748 = vmatprep.mubr.bf16.mxu0 %v1638_v0  ;;  %1385 = vmatprep.mubr.msk.bf16.mxu1 %vm1640_vm2, %v1639_v11 }
 0x248   :  { %719 = vmatpush1.bf16.msra.mxu0 %v1700_v10  ;;  %1372 = vmatpush3.bf16.msra.mxu1 %v1767_v30 }
 0x249   :  { %720 = vmatprep.subr.bf16.mxu0 %v1704_v12  ;;  %1373 = vmatprep.subr.bf16.mxu1 %v1639_v11 }
 0x24c   :  { %721 = vmatpush1.bf16.msra.mxu0 %v1709_v14  ;;  %1374 = vmatpush3.bf16.msra.mxu1 %v1774_v31 }
 0x24d   :  { %722 = vmatprep.subr.bf16.mxu0 %v1713_v15  ;;  %1375 = vmatprep.subr.bf16.mxu1 %v1639_v11 }
 0x250   :  { %723 = vmatpush1.bf16.msra.mxu0 %v1720_v17  ;;  %1376 = vmatpush3.bf16.msra.mxu1 %v1782_v32 }
 0x251   :  { %724 = vmatprep.subr.bf16.mxu0 %v1723_v18  ;;  %1377 = vmatprep.subr.bf16.mxu1 %v1639_v11 }
 0x254   :  { %725 = vmatpush1.bf16.msra.mxu0 %v1727_v19  ;;  %1378 = vmatpush3.bf16.msra.mxu1 %v1790_v33 }
 0x255   :  { %726 = vmatprep.subr.bf16.mxu0 %v1731_v20  ;;  %1379 = vmatprep.subr.bf16.mxu1 %v1639_v11 }
 0x258   :  { %727 = vmatpush1.bf16.msra.mxu0 %v1737_v22  ;;  %1380 = vmatpush3.bf16.msra.mxu1 %v1797_v34 }
 0x259   :  { %728 = vmatprep.subr.bf16.mxu0 %v1740_v23  ;;  %1381 = vmatprep.subr.bf16.mxu1 %v1639_v11 }
 0x25c   :  { %729 = vmatpush1.bf16.msra.mxu0 %v1743_v24  ;;  %1382 = vmatpush3.bf16.msra.mxu1 %v1805_v35 }
 0x25d   :  { %730 = vmatprep.subr.bf16.mxu0 %v1745_v25  ;;  %1383 = vmatprep.subr.bf16.mxu1 %v1639_v11 }
 0x260   :  { %731 = vmatpush1.bf16.msra.mxu0 %v1753_v27  ;;  %1384 = vmatpush3.bf16.msra.mxu1 %v1811_v36 }
 0x261   :  { %820 = vmatprep.subr.bf16.mxu0 %v1687_v3  ;;  %1389 = vmatprep.subr.bf16.mxu1 %v1639_v11 }
 0x316   :  { %v646_v21 = vpop.f32.mrb[8].mxu0  ;;  %v687_v6 = vpop.f32.mrb[32].mxu1 }
 0x317   :  { %v693_v39 = vadd.f32 %v646_v21, %v1847_v51  ;;  %v648_v41 = vpop.f32.mrb[9].mxu0  ;;  %v1367_v46 = vpop.f32.mrb[33].mxu1  ;;  %v707_v49 = vadd.f32 %v687_v6, %v1876_v37 }
 0x318   :  { %v694_v48 = vadd.f32 %v648_v41, %v1849_v53  ;;  %v650_v50 = vpop.f32.mrb[10].mxu0  ;;  %v690_v52 = vpop.f32.mrb[34].mxu1 }
 0x319   :  { %v1212_v54 = vmul.f32 -1.442695, %v693_v39  ;;  %v651_v56 = vpop.f32.mrb[11].mxu0  ;;  %v1368_v38 = vpop.f32.mrb[35].mxu1 }
 0x31a   :  { %v1213_v40 = vmul.f32 -1.442695, %v694_v48 }
 0x31b   :  { %1523 = vpow2.f32 %v1212_v54 }
 0x31c   :  { %1525 = vpow2.f32 %v1213_v40 }
 0x325   :  { %v1524_v42 = vpop.eup %1523 }
 0x326   :  { %v701_v43 = vadd.f32 1.0, %v1524_v42  ;;  %v1526_v47 = vpop.eup %1525 }
 0x327   :  { %v702_v62 = vadd.f32 1.0, %v1526_v47 }
 0x328   :  { %1527 = vrcp.f32 %v701_v43 }
 0x329   :  { %1529 = vrcp.f32 %v702_v62 }
 0x332   :  { %v1528_v51 = vpop.eup %1527 }
 0x333   :  { %v708_v44 = vmul.f32 %v1528_v51, %v707_v49  ;;  %v1530_v45 = vpop.eup %1529 }
 0x334   :  { %v711_v13 = vsub.f32 1.0, %v1530_v45  ;;  %v713_v29 = vmul.f32 %v1530_v45, %v1924_v16 }
 0x335   :  { %v709_v53 = vadd.f32 %v708_v44, %v1865_v58 }
 0x337   :  { %1531 = vtanh.f32 %v709_v53 }
 0x341   :  { %v1532_v28 = vpop.eup %1531 }
 0x342   :  { %v712_v7 = vmul.f32 %v1532_v28, %v711_v13 }
 0x344   :  { %v1968_v21 = vadd.f32 %v713_v29, %v712_v7 }
 0x346   :  { %v715_v39 = vpack.c.bf16 %v1968_v21, %v1968_v21 }
 0x348   :  { %749 = vmatmul.mubr.bf16.vlgmr.msra.gmra.mrb[12].mxu0 %v715_v39  ;;  %1386 = vmatmul.mubr.bf16.vlgmr.msra.gmra.mrb[36].mxu1 %v715_v39  ;;  %v1495_v39 = vld [vmem:[#allocation2 + $0xd8] ss:$12 sps:$4 sm:$0xff]  }
 0x349   :  { %821 = vmatpush1.bf16.msra.mxu0 %v1689_v5  ;;  %1390 = vmatpush3.bf16.msra.mxu1 %v1751_v26 }
 0x34a   :  { %822 = vmatprep.subr.bf16.mxu0 %v1697_v8  ;;  %1391 = vmatprep.subr.bf16.mxu1 %v1639_v11 }
 0x34b   :  { %852 = vmatprep.mubr.bf16.mxu0 %v1638_v0  ;;  %1405 = vmatprep.mubr.msk.bf16.mxu1 %vm1640_vm2, %v1639_v11 }
 0x34d   :  { %823 = vmatpush1.bf16.msra.mxu0 %v1700_v10  ;;  %1392 = vmatpush3.bf16.msra.mxu1 %v1767_v30 }
 0x34e   :  { %824 = vmatprep.subr.bf16.mxu0 %v1704_v12  ;;  %1393 = vmatprep.subr.bf16.mxu1 %v1639_v11 }
 0x351   :  { %825 = vmatpush1.bf16.msra.mxu0 %v1709_v14  ;;  %1394 = vmatpush3.bf16.msra.mxu1 %v1774_v31 }
 0x352   :  { %826 = vmatprep.subr.bf16.mxu0 %v1713_v15  ;;  %1395 = vmatprep.subr.bf16.mxu1 %v1639_v11 }
 0x355   :  { %827 = vmatpush1.bf16.msra.mxu0 %v1720_v17  ;;  %1396 = vmatpush3.bf16.msra.mxu1 %v1782_v32 }
 0x356   :  { %828 = vmatprep.subr.bf16.mxu0 %v1723_v18  ;;  %1397 = vmatprep.subr.bf16.mxu1 %v1639_v11 }
 0x359   :  { %829 = vmatpush1.bf16.msra.mxu0 %v1727_v19  ;;  %1398 = vmatpush3.bf16.msra.mxu1 %v1790_v33 }
 0x35a   :  { %830 = vmatprep.subr.bf16.mxu0 %v1731_v20  ;;  %1399 = vmatprep.subr.bf16.mxu1 %v1639_v11 }
 0x35d   :  { %831 = vmatpush1.bf16.msra.mxu0 %v1737_v22  ;;  %1400 = vmatpush3.bf16.msra.mxu1 %v1797_v34 }
 0x35e   :  { %832 = vmatprep.subr.bf16.mxu0 %v1740_v23  ;;  %1401 = vmatprep.subr.bf16.mxu1 %v1639_v11 }
 0x361   :  { %833 = vmatpush1.bf16.msra.mxu0 %v1743_v24  ;;  %1402 = vmatpush3.bf16.msra.mxu1 %v1805_v35 }
 0x362   :  { %834 = vmatprep.subr.bf16.mxu0 %v1745_v25  ;;  %1403 = vmatprep.subr.bf16.mxu1 %v1639_v11 }
 0x365   :  { %835 = vmatpush1.bf16.msra.mxu0 %v1753_v27  ;;  %1404 = vmatpush3.bf16.msra.mxu1 %v1811_v36 }
 0x366   :  { %924 = vmatprep.subr.bf16.mxu0 %v1687_v3  ;;  %1409 = vmatprep.subr.bf16.mxu1 %v1639_v11 }
 0x41b   :  { %v750_v58 = vpop.f32.mrb[12].mxu0  ;;  %v791_v6 = vpop.f32.mrb[36].mxu1 }
 0x41c   :  { %v797_v41 = vadd.f32 %v750_v58, %v1851_v55  ;;  %v752_v46 = vpop.f32.mrb[13].mxu0  ;;  %v1387_v48 = vpop.f32.mrb[37].mxu1  ;;  %v811_v49 = vadd.f32 %v791_v6, %v1876_v37  ;;  %v1497_v58 = vld [vmem:[#allocation2 + $0x108] ss:$12 sps:$4 sm:$0xff]   ;;  %v1498_v6 = vld [vmem:[#allocation2 + $0x120] ss:$12 sps:$4 sm:$0xff]  }
 0x41d   :  { %v798_v50 = vadd.f32 %v752_v46, %v1853_v57  ;;  %v754_v52 = vpop.f32.mrb[14].mxu0  ;;  %v794_v54 = vpop.f32.mrb[38].mxu1  ;;  %v1500_v46 = vld [vmem:[#allocation2 + $0x150] ss:$12 sps:$4 sm:$0xff]   ;;  %v1501_v48 = vld [vmem:[#allocation2 + $0x168] ss:$12 sps:$4 sm:$0xff]  }
 0x41e   :  { %v1214_v56 = vmul.f32 -1.442695, %v797_v41  ;;  %v755_v38 = vpop.f32.mrb[15].mxu0  ;;  %v1388_v40 = vpop.f32.mrb[39].mxu1  ;;  %v1499_v41 = vld [vmem:[#allocation2 + $0x138] ss:$12 sps:$4 sm:$0xff]  }
 0x41f   :  { %v1215_v42 = vmul.f32 -1.442695, %v798_v50  ;;  %v1502_v50 = vld [vmem:[#allocation2 + $0x180] ss:$12 sps:$4 sm:$0xff]  }
 0x420   :  { %1533 = vpow2.f32 %v1214_v56 }
 0x421   :  { %1535 = vpow2.f32 %v1215_v42 }
 0x42a   :  { %v1534_v43 = vpop.eup %1533 }
 0x42b   :  { %v805_v3 = vadd.f32 1.0, %v1534_v43  ;;  %v1536_v47 = vpop.eup %1535 }
 0x42c   :  { %v806_v62 = vadd.f32 1.0, %v1536_v47 }
 0x42d   :  { %1537 = vrcp.f32 %v805_v3 }
 0x42e   :  { %1539 = vrcp.f32 %v806_v62 }
 0x437   :  { %v1538_v55 = vpop.eup %1537 }
 0x438   :  { %v812_v51 = vmul.f32 %v1538_v55, %v811_v49  ;;  %v1540_v44 = vpop.eup %1539 }
 0x439   :  { %v815_v53 = vsub.f32 1.0, %v1540_v44  ;;  %v817_v28 = vmul.f32 %v1540_v44, %v1968_v21 }
 0x43a   :  { %v813_v57 = vadd.f32 %v812_v51, %v1867_v60 }
 0x43c   :  { %1541 = vtanh.f32 %v813_v57 }
 0x446   :  { %v1542_v45 = vpop.eup %1541 }
 0x447   :  { %v816_v13 = vmul.f32 %v1542_v45, %v815_v53 }
 0x449   :  { %v2012_v7 = vadd.f32 %v817_v28, %v816_v13  ;;  %v1032_v28 = vrot.slane %v1924_v16, 2 }
 0x44b   :  { %v819_v29 = vpack.c.bf16 %v2012_v7, %v2012_v7 }
 0x44d   :  { %853 = vmatmul.mubr.bf16.vlgmr.msra.gmra.mrb[16].mxu0 %v819_v29  ;;  %1406 = vmatmul.mubr.bf16.vlgmr.msra.gmra.mrb[40].mxu1 %v819_v29 }
 0x44e   :  { %925 = vmatpush1.bf16.msra.mxu0 %v1689_v5  ;;  %1410 = vmatpush3.bf16.msra.mxu1 %v1751_v26 }
 0x44f   :  { %926 = vmatprep.subr.bf16.mxu0 %v1697_v8  ;;  %1411 = vmatprep.subr.bf16.mxu1 %v1639_v11 }
 0x450   :  { %956 = vmatprep.mubr.bf16.mxu0 %v1638_v0  ;;  %1425 = vmatprep.mubr.msk.bf16.mxu1 %vm1640_vm2, %v1639_v11 }
 0x452   :  { %927 = vmatpush1.bf16.msra.mxu0 %v1700_v10  ;;  %1412 = vmatpush3.bf16.msra.mxu1 %v1767_v30 }
 0x453   :  { %928 = vmatprep.subr.bf16.mxu0 %v1704_v12  ;;  %1413 = vmatprep.subr.bf16.mxu1 %v1639_v11 }
 0x456   :  { %929 = vmatpush1.bf16.msra.mxu0 %v1709_v14  ;;  %1414 = vmatpush3.bf16.msra.mxu1 %v1774_v31 }
 0x457   :  { %930 = vmatprep.subr.bf16.mxu0 %v1713_v15  ;;  %1415 = vmatprep.subr.bf16.mxu1 %v1639_v11 }
 0x45a   :  { %931 = vmatpush1.bf16.msra.mxu0 %v1720_v17  ;;  %1416 = vmatpush3.bf16.msra.mxu1 %v1782_v32 }
 0x45b   :  { %932 = vmatprep.subr.bf16.mxu0 %v1723_v18  ;;  %1417 = vmatprep.subr.bf16.mxu1 %v1639_v11 }
 0x45e   :  { %933 = vmatpush1.bf16.msra.mxu0 %v1727_v19  ;;  %1418 = vmatpush3.bf16.msra.mxu1 %v1790_v33 }
 0x45f   :  { %934 = vmatprep.subr.bf16.mxu0 %v1731_v20  ;;  %1419 = vmatprep.subr.bf16.mxu1 %v1639_v11 }
 0x462   :  { %935 = vmatpush1.bf16.msra.mxu0 %v1737_v22  ;;  %1420 = vmatpush3.bf16.msra.mxu1 %v1797_v34 }
 0x463   :  { %936 = vmatprep.subr.bf16.mxu0 %v1740_v23  ;;  %1421 = vmatprep.subr.bf16.mxu1 %v1639_v11 }
 0x466   :  { %937 = vmatpush1.bf16.msra.mxu0 %v1743_v24  ;;  %1422 = vmatpush3.bf16.msra.mxu1 %v1805_v35 }
 0x467   :  { %938 = vmatprep.subr.bf16.mxu0 %v1745_v25  ;;  %1423 = vmatprep.subr.bf16.mxu1 %v1639_v11 }
 0x46a   :  { %939 = vmatpush1.bf16.msra.mxu0 %v1753_v27  ;;  %1424 = vmatpush3.bf16.msra.mxu1 %v1811_v36 }
 0x46b   :  { %1429 = vmatprep.subr.bf16.mxu0 %v1639_v11 }
 0x520   :  { %v854_v0 = vpop.f32.mrb[16].mxu0  ;;  %v895_v5 = vpop.f32.mrb[40].mxu1 }
 0x521   :  { %v901_v8 = vadd.f32 %v854_v0, %v1855_v59  ;;  %v856_v10 = vpop.f32.mrb[17].mxu0  ;;  %v1407_v12 = vpop.f32.mrb[41].mxu1  ;;  %v915_v27 = vadd.f32 %v895_v5, %v1876_v37  ;;  %v1035_v5 = vrot.slane %v1968_v21, 1 }
 0x522   :  { %v902_v14 = vadd.f32 %v856_v10, %v1857_v61  ;;  %v858_v15 = vpop.f32.mrb[18].mxu0  ;;  %v898_v17 = vpop.f32.mrb[42].mxu1 }
 0x523   :  { %v1216_v18 = vmul.f32 -1.442695, %v901_v8  ;;  %v859_v19 = vpop.f32.mrb[19].mxu0  ;;  %v1408_v20 = vpop.f32.mrb[43].mxu1  ;;  %v1029_v8 = vrot.slane %v1880_v4, 3 }
 0x524   :  { %v1217_v22 = vmul.f32 -1.442695, %v902_v14 }
 0x525   :  { %1543 = vpow2.f32 %v1216_v18 }
 0x526   :  { %1545 = vpow2.f32 %v1217_v22 }
 0x52f   :  { %v1544_v23 = vpop.eup %1543 }
 0x530   :  { %v909_v24 = vadd.f32 1.0, %v1544_v23  ;;  %v1546_v25 = vpop.eup %1545 }
 0x531   :  { %v910_v26 = vadd.f32 1.0, %v1546_v25 }
 0x532   :  { %1547 = vrcp.f32 %v909_v24 }
 0x533   :  { %1549 = vrcp.f32 %v910_v26 }
 0x53c   :  { %v1548_v30 = vpop.eup %1547 }
 0x53d   :  { %v916_v31 = vmul.f32 %v1548_v30, %v915_v27  ;;  %v1550_v33 = vpop.eup %1549 }
 0x53e   :  { %v919_v34 = vsub.f32 1.0, %v1550_v33  ;;  %v921_v59 = vmul.f32 %v1550_v33, %v2012_v7 }
 0x53f   :  { %v917_v32 = vadd.f32 %v916_v31, %v1869_v1  ;;  %v1496_v1 = vld [vmem:[#allocation2 + $0xf0] ss:$12 sps:$4 sm:$0xff]  }
 0x541   :  { %1551 = vtanh.f32 %v917_v32 }
 0x54b   :  { %v1552_v35 = vpop.eup %1551 }
 0x54c   :  { %v920_v36 = vmul.f32 %v1552_v35, %v919_v34 }
 0x54e   :  { %v2055_v61 = vadd.f32 %v921_v59, %v920_v36 }
 0x550   :  { %v923_v60 = vpack.c.bf16 %v2055_v61, %v2055_v61 }
 0x552   :  { %957 = vmatmul.mubr.bf16.vlgmr.msra.gmra.mrb[20].mxu0 %v923_v60  ;;  %1426 = vmatmul.mubr.bf16.vlgmr.msra.gmra.mrb[44].mxu1 %v923_v60 }
 0x553   :  { %1445 = vmatprep.mubr.msk.bf16.mxu0 %vm1640_vm2, %v1639_v11  ;;  %1430 = vmatpush3.bf16.msra.mxu0 %v1495_v39 }
 0x554   :  { %1431 = vmatprep.subr.bf16.mxu0 %v1639_v11 }
 0x557   :  { %1432 = vmatpush3.bf16.msra.mxu0 %v1496_v1 }
 0x558   :  { %1433 = vmatprep.subr.bf16.mxu0 %v1639_v11 }
 0x55b   :  { %1434 = vmatpush3.bf16.msra.mxu0 %v1497_v58 }
 0x55c   :  { %1435 = vmatprep.subr.bf16.mxu0 %v1639_v11 }
 0x55f   :  { %1436 = vmatpush3.bf16.msra.mxu0 %v1498_v6 }
 0x560   :  { %1437 = vmatprep.subr.bf16.mxu0 %v1639_v11 }
 0x563   :  { %1438 = vmatpush3.bf16.msra.mxu0 %v1499_v41 }
 0x564   :  { %1439 = vmatprep.subr.bf16.mxu0 %v1639_v11 }
 0x567   :  { %1440 = vmatpush3.bf16.msra.mxu0 %v1500_v46 }
 0x568   :  { %1441 = vmatprep.subr.bf16.mxu0 %v1639_v11 }
 0x56b   :  { %1442 = vmatpush3.bf16.msra.mxu0 %v1501_v48 }
 0x56c   :  { %1443 = vmatprep.subr.bf16.mxu0 %v1639_v11 }
 0x56f   :  { %1444 = vmatpush3.bf16.msra.mxu0 %v1502_v50 }
 0x625   :  { %v958_v52 = vpop.f32.mrb[20].mxu0  ;;  %v999_v54 = vpop.f32.mrb[44].mxu1 }
 0x626   :  { %v1005_v56 = vadd.f32 %v958_v52, %v1859_v63  ;;  %v960_v38 = vpop.f32.mrb[21].mxu0  ;;  %v1427_v40 = vpop.f32.mrb[45].mxu1  ;;  %v1019_v53 = vadd.f32 %v999_v54, %v1876_v37  ;;  %v1038_v37 = vrot.slane %v2055_v61, 7 }
 0x627   :  { %v1006_v42 = vadd.f32 %v960_v38, %v1861_v2  ;;  %v962_v43 = vpop.f32.mrb[22].mxu0  ;;  %v1002_v3 = vpop.f32.mrb[46].mxu1 }
 0x628   :  { %v1218_v47 = vmul.f32 -1.442695, %v1005_v56  ;;  %v963_v62 = vpop.f32.mrb[23].mxu0  ;;  %v1428_v49 = vpop.f32.mrb[47].mxu1 }
 0x629   :  { %v1219_v55 = vmul.f32 -1.442695, %v1006_v42 }
 0x62a   :  { %1553 = vpow2.f32 %v1218_v47 }
 0x62b   :  { %1555 = vpow2.f32 %v1219_v55 }
 0x634   :  { %v1554_v51 = vpop.eup %1553 }
 0x635   :  { %v1013_v57 = vadd.f32 1.0, %v1554_v51  ;;  %v1556_v11 = vpop.eup %1555 }
 0x636   :  { %v1014_v44 = vadd.f32 1.0, %v1556_v11 }
 0x637   :  { %1557 = vrcp.f32 %v1013_v57 }
 0x638   :  { %1559 = vrcp.f32 %v1014_v44 }
 0x641   :  { %v1558_v63 = vpop.eup %1557 }
 0x642   :  { %v1020_v45 = vmul.f32 %v1558_v63, %v1019_v53  ;;  %v1560_v13 = vpop.eup %1559 }
 0x643   :  { %v1023_v29 = vsub.f32 1.0, %v1560_v13  ;;  %v1025_v10 = vmul.f32 %v1560_v13, %v2055_v61 }
 0x644   :  { %v1021_v2 = vadd.f32 %v1020_v45, %v1871_v9  ;;  %v1044_v9 = vsel %vm1043_vm3, %v1029_v8, %v1032_v28 }
 0x645   :  { %v1046_v15 = vsel %vm1045_vm4, %v1044_v9, %v1035_v5 }
 0x646   :  { %1561 = vtanh.f32 %v1021_v2  ;;  %v1048_v16 = vsel %vm1047_vm5, %v1046_v15, %v2012_v7 }
 0x647   :  { %v1049_v21 = vsel %vm144_vm0, %v1048_v16, %v1038_v37 }
 0x650   :  { %v1562_v0 = vpop.eup %1561 }
 0x651   :  { %v1024_v12 = vmul.f32 %v1562_v0, %v1023_v29 }
 0x653   :  { %v1026_v14 = vadd.f32 %v1025_v10, %v1024_v12 }
 0x655   :  { %v1041_v17 = vrot.slane %v1026_v14, 6  ;;  %1027 = vst [vmem:[#allocation6] sm:$0xff] %v1026_v14 }
 0x657   :  { %v1051_v18 = vsel %vm1050_vm6, %v1049_v21, %v1041_v17 }
 0x658   :  { %v1052_v19 = vpack.c.bf16 %v1051_v18, %v1051_v18 }
 0x65a   :  { %1446 = vmatmul.mubr.bf16.vlgmr.msra.gmra.mrb[24].mxu0 %v1052_v19 }
 0x65b   :  { %1596 = shalt.err (!%p1593_p12)
}
 0x65c   :  { %s1597_s21 = scalar_lea.hbm %s2111_s5, 128 }
 0x65d   :  { %p1598_p13 = scmp.ne.s32.totalorder %s2111_s5, %s1597_s21  ;;  %p1601_p0 = scmp.lt.u32.totalorder %s1597_s21, %s2111_s5 }
 0x65f   :  { %p1603_p1 = pnand %p1601_p0, %p1598_p13 }
 0x661   :  { %1606 = shalt.err (!%p1603_p1)
}
 0x662   :  { %1161 = dma.vmem_to_hbm [thread:$0]  %s1159_s17, 128, %s2111_s5, [#allocation7]   ;;  %v88_v4 = vld [vmem:[%s2108_s2 + $0x2] ss:$0 sm:$0xff] }
 0x663   :  { %s1642_s30 = smov [#allocation5]  }
 0x664   :  { %s1148_s6 = sshll.u32 %s1642_s30, 4  ;;  %s1149_s6 = int_to_ptr.vmem [resolvable:$true] %s1148_s6 }
 0x665   :  { %s1607_s7 = scalar_lea.vmem %s1149_s6, 128  ;;  %p1612_p3 = scmp.lt.s32.totalorder %s1149_s6, %s1149_s6 }
 0x666   :  { %p1608_p2 = scmp.ne.s32.totalorder %s1149_s6, %s1607_s7  ;;  %p1613_p4 = scmp.lt.s32.totalorder %s1607_s7, %s1607_s7 }
 0x668   :  { %p1614_p5 = por %p1613_p4, %p1612_p3 }
 0x66a   :  { %p1615_p6 = pnand %p1614_p5, %p1608_p2 }
 0x72d   :  { %v1135_v7 = vpop.f32.mrb[24].mxu0 }
 0x72e   :  { %v1136_v20 = vadd.f32 %v1135_v7, %v88_v4  ;;  %v1447_v22 = vpop.f32.mrb[25].mxu0 }
 0x72f   :  { %v1138_v23 = vpop.f32.mrb[26].mxu0 }
 0x730   :  { %1141 = vst [vmem:[#allocation5] sm:$0x3f] %v1136_v20  ;;  %v1448_v24 = vpop.f32.mrb[27].mxu0 }
 0x731   :  { %1618 = shalt.err (!%p1615_p6)
}
 0x732   :  { %s1619_s2 = scalar_lea.hbm %s2110_s4, 128 }
 0x733   :  { %p1620_p7 = scmp.ne.s32.totalorder %s2110_s4, %s1619_s2  ;;  %p1623_p8 = scmp.lt.u32.totalorder %s1619_s2, %s2110_s4 }
 0x735   :  { %p1625_p9 = pnand %p1623_p8, %p1620_p7 }
 0x737   :  { %1628 = shalt.err (!%p1625_p9)
}
 0x738   :  { %1151 = dma.vmem_to_hbm [thread:$0]  %s1149_s6, 128, %s2110_s4, [#allocation4]  }
 0x739   :  { %1631 = dma.done.wait [#allocation4], 128  }
 0x73a   :  { %1632 = vsyncadd [#allocation4], 4294967168 }
 0x73b   :  { %1633 = dma.done.wait [#allocation7], 128  }
 0x73c   :  { %1634 = vsyncadd [#allocation7], 4294967168 }
 0x73d   :  { %1168 = vsyncpa [#allocation3], 1 }
 0x73e   :  { %1169 = vsyncpa [#allocation4], 1 }
 0x73f   :  { %1170 = vsyncpa [#allocation7], 1 }

</bundles_post_ra>
